<compile_context>
chip_gen: v5e
topology: v5e:2x2
jax: 0.10.0
libtpu: 0.0.40
codegen_flags: <defaults>
</compile_context>

<pallas_src>
import math

import jax
import jax.numpy as jnp
from jax import lax
from jax.experimental import pallas as pl
from jax.experimental.pallas import tpu as pltpu


HIDDEN = 16                 # self.hidden_dim in the PyTorch module
DEFAULT_BLOCK_BATCH = 4096  # multiple of 256 (v6e/v7x MXU M) and 128 (v5e)


def _leaky_relu(v):
    # nn.LeakyReLU(0.2): max(v, 0.2*v) is exact for 0 < slope < 1 and saves a VALU op.
    return jnp.maximum(v, 0.2 * v)


def _density_kernel(
    x_ref,
    w1_ref, b1_ref,
    w2_ref, b2_ref,
    w3_ref, b3_ref,
    w4_ref, b4_ref,
    o_ref,
):
    h = x_ref[...]                                    # (tb, d_in) f32
    for w_ref, b_ref in ((w1_ref, b1_ref), (w2_ref, b2_ref),
                         (w3_ref, b3_ref), (w4_ref, b4_ref)):
        # bf16 x bf16 -> f32 accumulate: single-pass MXU on all generations.
        h = _leaky_relu(
            jnp.dot(h.astype(jnp.bfloat16), w_ref[...],
                    preferred_element_type=jnp.float32) + b_ref[...])

    # 30.2 * softmax(h, dim=1), numerically stable.
    m = jnp.max(h, axis=1, keepdims=True)
    e = jnp.exp(h - m)
    denom = jnp.sum(e, axis=1, keepdims=True)
    inv = pl.reciprocal(denom, approx=True)           # EUP vrcp: free bundle slot
    inv = inv * (2.0 - denom * inv)                   # one Newton step -> ~f32 exact
    o_ref[...] = (30.2 * e * inv).astype(o_ref.dtype)


def _round_up(n, m):
    return ((n + m - 1) // m) * m


def density_estimator(x, params, *, block_batch=DEFAULT_BLOCK_BATCH):
    """x: (B, dimer_atoms) float32.  params: dict of weights/biases (see init_params)."""
    B, d_in = x.shape
    output_dim = params["w4"].shape[1]

    # Batch tile selection.
    if B <= block_batch:
        tb = max(8, _round_up(B, 8))          # one tile covering the batch
        if B > 256:
            # v7x megacore: prefer two tiles so the "parallel" axis feeds both TCs.
            tb = _round_up(pl.cdiv(B, 2), 256)
    else:
        tb = block_batch
    n_tiles = pl.cdiv(B, tb)

    # Weights cast to bf16 once (MXU-native operand); biases stay f32 (added to
    # the f32 accumulator).  All are VMEM-resident via constant index maps.
    weights = []
    for i in range(1, 5):
        weights.append(params[f"w{i}"].astype(jnp.bfloat16))
        weights.append(params[f"b{i}"].astype(jnp.float32))
    weights = tuple(weights)

    def const_spec(a):
        # Full-array block, constant block index -> fetched once, stays in VMEM.
        return pl.BlockSpec(a.shape, lambda i: (0, 0))

    d1, d2, d3 = HIDDEN, HIDDEN * 4, HIDDEN * 16
    flops = 2 * B * (d_in * d1 + d1 * d2 + d2 * d3 + d3 * output_dim)
    bytes_accessed = (4 * x.size + 4 * B * output_dim
                      + sum(int(w.size) * w.dtype.itemsize for w in weights))
    cost = pl.CostEstimate(
        flops=int(flops),
        transcendentals=int(B * output_dim),
        bytes_accessed=int(bytes_accessed),
    )

    return pl.pallas_call(
        _density_kernel,
        out_shape=jax.ShapeDtypeStruct((B, output_dim), jnp.float32),
        grid=(n_tiles,),
        in_specs=[pl.BlockSpec((tb, d_in), lambda i: (i, 0))]
                 + [const_spec(w) for w in weights],
        out_specs=pl.BlockSpec((tb, output_dim), lambda i: (i, 0)),
        compiler_params=pltpu.CompilerParams(
            dimension_semantics=("parallel",),      # megacore sharding on v7x
            vmem_limit_bytes=48 * 1024 * 1024,      # covers tb=4096 on all gens
        ),
        cost_estimate=cost,
    )(x, *weights)


def init_params(key, dimer_atoms, output_dim):
    """Deterministic init matching nn.Linear shapes (uniform +-1/sqrt(fan_in))."""
    dims = [dimer_atoms, HIDDEN, HIDDEN * 4, HIDDEN * 4 * 4, output_dim]
    params = {}
    for i in range(4):
        fan_in, fan_out = dims[i], dims[i + 1]
        key, kw, kb = jax.random.split(key, 3)
        bound = 1.0 / math.sqrt(fan_in)
        # stored (in, out): transpose of PyTorch's (out, in) weight layout
        params[f"w{i + 1}"] = jax.random.uniform(
            kw, (fan_in, fan_out), jnp.float32, -bound, bound)
        # bias kept 2D (1, out) so it lives cleanly in VMEM and broadcasts over rows
        params[f"b{i + 1}"] = jax.random.uniform(
            kb, (1, fan_out), jnp.float32, -bound, bound)
    return params


def _reference(x, params, compute_dtype=jnp.float32):
    """Pure-JAX forward matching the PyTorch module.

    compute_dtype=jnp.bfloat16 reproduces the kernel's matmul operand precision
    (bf16 operands, f32 accumulate) for a tight numerical comparison.
    """
    h = x
    for i in range(1, 5):
        w = params[f"w{i}"].astype(compute_dtype)
        h = jnp.dot(h.astype(compute_dtype), w,
                    preferred_element_type=jnp.float32,
                    precision=lax.Precision.HIGHEST) + params[f"b{i}"]
        h = jnp.maximum(h, 0.2 * h)
    return 30.2 * jax.nn.softmax(h, axis=1)


if __name__ == "__main__":
    key = jax.random.PRNGKey(0)
    k_x, k_x2, k_p = jax.random.split(key, 3)

    dimer_atoms = 8
    output_dim = 8
    params = init_params(k_p, dimer_atoms, output_dim)

    # Case 1: tiny batch, single tile.
    batch = 8
    x = jax.random.normal(k_x, (batch, dimer_atoms), jnp.float32)
    out = jax.block_until_ready(density_estimator(x, params))
    assert out.shape == (batch, output_dim)
    assert jnp.allclose(jnp.sum(out, axis=1), 30.2, atol=1e-3)
    # Tight check against a precision-matched (bf16-operand) reference.
    assert jnp.allclose(out, _reference(x, params, jnp.bfloat16), atol=2e-3, rtol=2e-3)
    # Loose check against the full-f32 reference (diff dominated by bf16 matmuls).
    assert jnp.allclose(out, _reference(x, params), atol=1e-1, rtol=5e-2)

    # Case 2: multi-tile grid with a partial (masked) last block.
    batch2 = 600
    x2 = jax.random.normal(k_x2, (batch2, dimer_atoms), jnp.float32)
    out2 = jax.block_until_ready(density_estimator(x2, params, block_batch=256))
    assert out2.shape == (batch2, output_dim)
    assert jnp.allclose(jnp.sum(out2, axis=1), 30.2, atol=1e-3)
    assert jnp.allclose(out2, _reference(x2, params, jnp.bfloat16), atol=2e-3, rtol=2e-3)
    assert jnp.allclose(out2, _reference(x2, params), atol=1e-1, rtol=5e-2)

    print("KERNEL_OK")
</pallas_src>

<mosaic_0001>
module attributes {stable_mosaic.version = 11 : i64} {
  func.func @_density_kernel(%arg0: i32, %arg1: memref<8x8xf32, #tpu.memory_space<vmem>>, %arg2: memref<8x16xbf16, #tpu.memory_space<vmem>>, %arg3: memref<1x16xf32, #tpu.memory_space<vmem>>, %arg4: memref<16x64xbf16, #tpu.memory_space<vmem>>, %arg5: memref<1x64xf32, #tpu.memory_space<vmem>>, %arg6: memref<64x256xbf16, #tpu.memory_space<vmem>>, %arg7: memref<1x256xf32, #tpu.memory_space<vmem>>, %arg8: memref<256x8xbf16, #tpu.memory_space<vmem>>, %arg9: memref<1x8xf32, #tpu.memory_space<vmem>>, %arg10: memref<8x8xf32, #tpu.memory_space<vmem>>) attributes {dimension_semantics = [#tpu.dimension_semantics<parallel>], iteration_bounds = array<i64: 1>, scalar_prefetch = 0 : i64, scratch_operands = 0 : i64, tpu.core_type = #tpu.core_type<tc>, window_params = [{transform_indices = @transform_0, window_bounds = array<i64: 8, 8>}, {pipeline_mode = #tpu.pipeline_mode<synchronous>, transform_indices = @transform_1, window_bounds = array<i64: 8, 16>}, {pipeline_mode = #tpu.pipeline_mode<synchronous>, transform_indices = @transform_2, window_bounds = array<i64: 1, 16>}, {pipeline_mode = #tpu.pipeline_mode<synchronous>, transform_indices = @transform_3, window_bounds = array<i64: 16, 64>}, {pipeline_mode = #tpu.pipeline_mode<synchronous>, transform_indices = @transform_4, window_bounds = array<i64: 1, 64>}, {pipeline_mode = #tpu.pipeline_mode<synchronous>, transform_indices = @transform_5, window_bounds = array<i64: 64, 256>}, {pipeline_mode = #tpu.pipeline_mode<synchronous>, transform_indices = @transform_6, window_bounds = array<i64: 1, 256>}, {pipeline_mode = #tpu.pipeline_mode<synchronous>, transform_indices = @transform_7, window_bounds = array<i64: 256, 8>}, {pipeline_mode = #tpu.pipeline_mode<synchronous>, transform_indices = @transform_8, window_bounds = array<i64: 1, 8>}, {transform_indices = @transform_9, window_bounds = array<i64: 8, 8>}]} {
    %c0 = arith.constant 0 : index
    %c0_0 = arith.constant 0 : index
    %0 = vector.load %arg1[%c0, %c0_0] : memref<8x8xf32, #tpu.memory_space<vmem>>, vector<8x8xf32>
    %1 = arith.truncf %0 : vector<8x8xf32> to vector<8x8xbf16>
    %c0_1 = arith.constant 0 : index
    %c0_2 = arith.constant 0 : index
    %2 = vector.load %arg2[%c0_1, %c0_2] : memref<8x16xbf16, #tpu.memory_space<vmem>>, vector<8x16xbf16>
    %cst = arith.constant dense<0.000000e+00> : vector<8x16xf32>
    %3 = tpu.matmul %1, %2, %cst {dimension_numbers = #tpu.dot_dimension_numbers<[1], [0], [0], [1], [0, 0, 1, 1], [], []>} : vector<8x8xbf16>, vector<8x16xbf16>, vector<8x16xf32> -> vector<8x16xf32>
    %c0_3 = arith.constant 0 : index
    %c0_4 = arith.constant 0 : index
    %4 = vector.load %arg3[%c0_3, %c0_4] : memref<1x16xf32, #tpu.memory_space<vmem>>, vector<1x16xf32>
    %5 = vector.broadcast %4 : vector<1x16xf32> to vector<8x16xf32>
    %6 = arith.addf %3, %5 : vector<8x16xf32>
    %cst_5 = arith.constant 2.000000e-01 : f32
    %7 = vector.broadcast %cst_5 : f32 to vector<8x16xf32>
    %8 = arith.mulf %7, %6 : vector<8x16xf32>
    %9 = arith.maximumf %6, %8 : vector<8x16xf32>
    %10 = arith.truncf %9 : vector<8x16xf32> to vector<8x16xbf16>
    %c0_6 = arith.constant 0 : index
    %c0_7 = arith.constant 0 : index
    %11 = vector.load %arg4[%c0_6, %c0_7] : memref<16x64xbf16, #tpu.memory_space<vmem>>, vector<16x64xbf16>
    %cst_8 = arith.constant dense<0.000000e+00> : vector<8x64xf32>
    %12 = tpu.matmul %10, %11, %cst_8 {dimension_numbers = #tpu.dot_dimension_numbers<[1], [0], [0], [1], [0, 0, 1, 1], [], []>} : vector<8x16xbf16>, vector<16x64xbf16>, vector<8x64xf32> -> vector<8x64xf32>
    %c0_9 = arith.constant 0 : index
    %c0_10 = arith.constant 0 : index
    %13 = vector.load %arg5[%c0_9, %c0_10] : memref<1x64xf32, #tpu.memory_space<vmem>>, vector<1x64xf32>
    %14 = vector.broadcast %13 : vector<1x64xf32> to vector<8x64xf32>
    %15 = arith.addf %12, %14 : vector<8x64xf32>
    %cst_11 = arith.constant 2.000000e-01 : f32
    %16 = vector.broadcast %cst_11 : f32 to vector<8x64xf32>
    %17 = arith.mulf %16, %15 : vector<8x64xf32>
    %18 = arith.maximumf %15, %17 : vector<8x64xf32>
    %19 = arith.truncf %18 : vector<8x64xf32> to vector<8x64xbf16>
    %c0_12 = arith.constant 0 : index
    %c0_13 = arith.constant 0 : index
    %20 = vector.load %arg6[%c0_12, %c0_13] : memref<64x256xbf16, #tpu.memory_space<vmem>>, vector<64x256xbf16>
    %cst_14 = arith.constant dense<0.000000e+00> : vector<8x256xf32>
    %21 = tpu.matmul %19, %20, %cst_14 {dimension_numbers = #tpu.dot_dimension_numbers<[1], [0], [0], [1], [0, 0, 1, 1], [], []>} : vector<8x64xbf16>, vector<64x256xbf16>, vector<8x256xf32> -> vector<8x256xf32>
    %c0_15 = arith.constant 0 : index
    %c0_16 = arith.constant 0 : index
    %22 = vector.load %arg7[%c0_15, %c0_16] : memref<1x256xf32, #tpu.memory_space<vmem>>, vector<1x256xf32>
    %23 = vector.broadcast %22 : vector<1x256xf32> to vector<8x256xf32>
    %24 = arith.addf %21, %23 : vector<8x256xf32>
    %cst_17 = arith.constant 2.000000e-01 : f32
    %25 = vector.broadcast %cst_17 : f32 to vector<8x256xf32>
    %26 = arith.mulf %25, %24 : vector<8x256xf32>
    %27 = arith.maximumf %24, %26 : vector<8x256xf32>
    %28 = arith.truncf %27 : vector<8x256xf32> to vector<8x256xbf16>
    %c0_18 = arith.constant 0 : index
    %c0_19 = arith.constant 0 : index
    %29 = vector.load %arg8[%c0_18, %c0_19] : memref<256x8xbf16, #tpu.memory_space<vmem>>, vector<256x8xbf16>
    %cst_20 = arith.constant dense<0.000000e+00> : vector<8x8xf32>
    %30 = tpu.matmul %28, %29, %cst_20 {dimension_numbers = #tpu.dot_dimension_numbers<[1], [0], [0], [1], [0, 0, 1, 1], [], []>} : vector<8x256xbf16>, vector<256x8xbf16>, vector<8x8xf32> -> vector<8x8xf32>
    %c0_21 = arith.constant 0 : index
    %c0_22 = arith.constant 0 : index
    %31 = vector.load %arg9[%c0_21, %c0_22] : memref<1x8xf32, #tpu.memory_space<vmem>>, vector<1x8xf32>
    %32 = vector.broadcast %31 : vector<1x8xf32> to vector<8x8xf32>
    %33 = arith.addf %30, %32 : vector<8x8xf32>
    %cst_23 = arith.constant 2.000000e-01 : f32
    %34 = vector.broadcast %cst_23 : f32 to vector<8x8xf32>
    %35 = arith.mulf %34, %33 : vector<8x8xf32>
    %36 = arith.maximumf %33, %35 : vector<8x8xf32>
    %cst_24 = arith.constant dense<0xFF800000> : vector<8xf32>
    %37 = vector.multi_reduction <maximumf>, %36, %cst_24 [1] : vector<8x8xf32> to vector<8xf32>
    %38 = vector.shape_cast %37 : vector<8xf32> to vector<8x1xf32>
    %39 = vector.broadcast %38 : vector<8x1xf32> to vector<8x8xf32>
    %40 = arith.subf %36, %39 : vector<8x8xf32>
    %41 = math.exp %40 : vector<8x8xf32>
    %cst_25 = arith.constant dense<0.000000e+00> : vector<8xf32>
    %42 = vector.multi_reduction <add>, %41, %cst_25 [1] : vector<8x8xf32> to vector<8xf32>
    %43 = vector.shape_cast %42 : vector<8xf32> to vector<8x1xf32>
    %44 = tpu.reciprocal %43 {approx = true} : vector<8x1xf32> -> vector<8x1xf32>
    %45 = arith.mulf %43, %44 : vector<8x1xf32>
    %cst_26 = arith.constant 2.000000e+00 : f32
    %46 = vector.broadcast %cst_26 : f32 to vector<8x1xf32>
    %47 = arith.subf %46, %45 : vector<8x1xf32>
    %48 = arith.mulf %44, %47 : vector<8x1xf32>
    %cst_27 = arith.constant 3.020000e+01 : f32
    %49 = vector.broadcast %cst_27 : f32 to vector<8x8xf32>
    %50 = arith.mulf %49, %41 : vector<8x8xf32>
    %51 = vector.broadcast %48 : vector<8x1xf32> to vector<8x8xf32>
    %52 = arith.mulf %50, %51 : vector<8x8xf32>
    %c0_28 = arith.constant 0 : index
    %c0_29 = arith.constant 0 : index
    %53 = vector.load %arg10[%c0_28, %c0_29] : memref<8x8xf32, #tpu.memory_space<vmem>>, vector<8x8xf32>
    tpu.vector_store %arg10[%c0_28, %c0_29], %52 {strides = array<i32>} : memref<8x8xf32, #tpu.memory_space<vmem>>, vector<8x8xf32>,
    return
  }
  func.func @transform_0(%arg0: i32) -> (i32, i32) {
    %c0_i32 = arith.constant 0 : i32
    %c0_i32_0 = arith.constant 0 : i32
    return %arg0, %c0_i32 : i32, i32
  }
  func.func @transform_1(%arg0: i32) -> (i32, i32) {
    %c0_i32 = arith.constant 0 : i32
    %c0_i32_0 = arith.constant 0 : i32
    %c0_i32_1 = arith.constant 0 : i32
    return %c0_i32, %c0_i32_0 : i32, i32
  }
  func.func @transform_2(%arg0: i32) -> (i32, i32) {
    %c0_i32 = arith.constant 0 : i32
    %c0_i32_0 = arith.constant 0 : i32
    %c0_i32_1 = arith.constant 0 : i32
    return %c0_i32, %c0_i32_0 : i32, i32
  }
  func.func @transform_3(%arg0: i32) -> (i32, i32) {
    %c0_i32 = arith.constant 0 : i32
    %c0_i32_0 = arith.constant 0 : i32
    %c0_i32_1 = arith.constant 0 : i32
    return %c0_i32, %c0_i32_0 : i32, i32
  }
  func.func @transform_4(%arg0: i32) -> (i32, i32) {
    %c0_i32 = arith.constant 0 : i32
    %c0_i32_0 = arith.constant 0 : i32
    %c0_i32_1 = arith.constant 0 : i32
    return %c0_i32, %c0_i32_0 : i32, i32
  }
  func.func @transform_5(%arg0: i32) -> (i32, i32) {
    %c0_i32 = arith.constant 0 : i32
    %c0_i32_0 = arith.constant 0 : i32
    %c0_i32_1 = arith.constant 0 : i32
    return %c0_i32, %c0_i32_0 : i32, i32
  }
  func.func @transform_6(%arg0: i32) -> (i32, i32) {
    %c0_i32 = arith.constant 0 : i32
    %c0_i32_0 = arith.constant 0 : i32
    %c0_i32_1 = arith.constant 0 : i32
    return %c0_i32, %c0_i32_0 : i32, i32
  }
  func.func @transform_7(%arg0: i32) -> (i32, i32) {
    %c0_i32 = arith.constant 0 : i32
    %c0_i32_0 = arith.constant 0 : i32
    %c0_i32_1 = arith.constant 0 : i32
    return %c0_i32, %c0_i32_0 : i32, i32
  }
  func.func @transform_8(%arg0: i32) -> (i32, i32) {
    %c0_i32 = arith.constant 0 : i32
    %c0_i32_0 = arith.constant 0 : i32
    %c0_i32_1 = arith.constant 0 : i32
    return %c0_i32, %c0_i32_0 : i32, i32
  }
  func.func @transform_9(%arg0: i32) -> (i32, i32) {
    %c0_i32 = arith.constant 0 : i32
    %c0_i32_0 = arith.constant 0 : i32
    return %arg0, %c0_i32 : i32, i32
  }
}

</mosaic_0001>

<bundles_post_ra>
// kernel: tpu_custom_call.1
= control target key start
LH: loop header
LB: loop body
LE: loop exit
PB: predicated region body
PF: predicated region fallthrough
CT: control target
= control target key end

     0   :  { %vm45_vm0 = vcmask 1043456   ;;  %vm41_vm1 = vcmask 64512   ;;  %s717_s0 = inlined_call_operand.vmem [shape: f32[8,8], index: 0, kind: input, shape index: {}]   ;;  %s718_s1 = inlined_call_operand.vmem [shape: bf16[8,16], index: 1, kind: input, shape index: {}]   ;;  %s719_s2 = inlined_call_operand.vmem [shape: f32[1,16], index: 2, kind: input, shape index: {}]   ;;  %s720_s3 = inlined_call_operand.vmem [shape: bf16[16,64], index: 3, kind: input, shape index: {}]   ;;  %s721_s4 = inlined_call_operand.vmem [shape: f32[1,64], index: 4, kind: input, shape index: {}]   ;;  %s722_s5 = inlined_call_operand.vmem [shape: bf16[64,256], index: 5, kind: input, shape index: {}]   ;;  %s723_s6 = inlined_call_operand.vmem [shape: f32[1,256], index: 6, kind: input, shape index: {}]   ;;  %s724_s7 = inlined_call_operand.vmem [shape: bf16[256,8], index: 7, kind: input, shape index: {}]   ;;  %s725_s8 = inlined_call_operand.vmem [shape: f32[1,8], index: 8, kind: input, shape index: {}]   ;;  %s726_s9 = inlined_call_operand.hbm [shape: f32[8,8], index: 9, kind: output, shape index: {}]  }
   0x1   :  { %v36_v0 = vld [vmem:[%s718_s1] sm:$0xf] }
   0x2   :  { %v34_v1 = vld [vmem:[%s717_s0] sm:$0xff]  ;;  %v47_v2 = vsel %vm45_vm0, %v36_v0, 0 }
   0x3   :  { %v35_v3 = vpack.c.bf16 %v34_v1, %v34_v1  ;;  %56 = vmatpush.bf16.msra.mxu2 %v47_v2 }
   0x4   :  { %14 = vsyncpa [#allocation3], 0  ;;  %v483_v4 = vld [vmem:[%s720_s3] sm:$0xff]  ;;  %v411_v5 = vld [vmem:[%s722_s5 + $0x30] sm:$0xf]  ;;  %vm77_vm2 = vcmask 130048  }
   0x5   :  { %88 = vmatpush.bf16.msra.mxu3 %v483_v4  ;;  %v491_v6 = vld [vmem:[%s722_s5 + $0x34] sm:$0xf0]  ;;  %v490_v7 = vld [vmem:[%s722_s5 + $0x34] sm:$0xf]  ;;  %v413_v9 = vld [vmem:[%s722_s5 + $0x38] sm:$0xf0] }
   0x6   :  { %379 = vmatmul.msk.bf16.vlgmr.msra.gmra.mxu2 %vm41_vm1, %v35_v3  ;;  %v412_v8 = vor.u32 %v491_v6, %v411_v5  ;;  %v403_v10 = vld [vmem:[%s722_s5 + $0x20] sm:$0xf]  ;;  %v489_v11 = vld [vmem:[%s722_s5 + $0x24] sm:$0xf0]  ;;  %v416_v12 = vor.u32 %v490_v7, %v413_v9  ;;  %v488_v13 = vld [vmem:[%s722_s5 + $0x24] sm:$0xf] }
   0x7   :  { %v405_v14 = vld [vmem:[%s722_s5 + $0x28] sm:$0xf0]  ;;  %v404_v15 = vor.u32 %v489_v11, %v403_v10  ;;  %v509_v17 = vld [vmem:[%s719_s2] ss:$0 sm:$0xff]  ;;  %v395_v24 = vld [vmem:[%s722_s5 + $0x10] sm:$0xf] }
   0x8   :  { %159 = vmatpush.bf16.msrb.mxu2 %v412_v8  ;;  %v408_v16 = vor.u32 %v488_v13, %v405_v14  ;;  %v487_v25 = vld [vmem:[%s722_s5 + $0x14] sm:$0xf0]  ;;  %v486_v26 = vld [vmem:[%s722_s5 + $0x14] sm:$0xf]  ;;  %v397_v28 = vld [vmem:[%s722_s5 + $0x18] sm:$0xf0] }
   0x9   :  { %172 = vmatpush.bf16.msrb.mxu3 %v416_v12  ;;  %v396_v27 = vor.u32 %v487_v25, %v395_v24  ;;  %v400_v29 = vor.u32 %v486_v26, %v397_v28  ;;  %v387_v30 = vld [vmem:[%s722_s5] sm:$0xf]  ;;  %v485_v31 = vld [vmem:[%s722_s5 + $0x4] sm:$0xf0]  ;;  %v484_v32 = vld [vmem:[%s722_s5 + $0x4] sm:$0xf] }
   0xa   :  { %v388_v33 = vor.u32 %v485_v31, %v387_v30  ;;  %v389_v34 = vld [vmem:[%s722_s5 + $0x8] sm:$0xf0]  ;;  %v499_v36 = vld [vmem:[%s724_s7 + $0x38] sm:$0xff]  ;;  %v498_v38 = vld [vmem:[%s724_s7 + $0x30] sm:$0xff]  ;;  %vm151_vm3 = vcmask 523264   ;;  %s370_s11 = sshll.u32 %s726_s9, 4  ;;  %s371_s11 = int_to_ptr.hbm [resolvable:$true] %s370_s11 }
   0xb   :  { %v392_v35 = vor.u32 %v484_v32, %v389_v34  ;;  %v507_v37 = vld [vmem:[%s724_s7 + $0x78] sm:$0xff]  ;;  %319 = vmatpush.bf16.msra.mxu0 %v499_v36  ;;  %v506_v39 = vld [vmem:[%s724_s7 + $0x70] sm:$0xff]  ;;  %v497_v40 = vld [vmem:[%s724_s7 + $0x28] sm:$0xff] }
   0xc   :  { %160 = vmatpush.bf16.msrb.mxu2 %v404_v15  ;;  %332 = vmatpush.bf16.msra.mxu1 %v507_v37  ;;  %v505_v41 = vld [vmem:[%s724_s7 + $0x68] sm:$0xff]  ;;  %v496_v42 = vld [vmem:[%s724_s7 + $0x20] sm:$0xff]  ;;  %v495_v44 = vld [vmem:[%s724_s7 + $0x18] sm:$0xff] }
   0xd   :  { %173 = vmatpush.bf16.msrb.mxu3 %v408_v16  ;;  %v504_v43 = vld [vmem:[%s724_s7 + $0x60] sm:$0xff]  ;;  %v503_v45 = vld [vmem:[%s724_s7 + $0x58] sm:$0xff]  ;;  %v494_v46 = vld [vmem:[%s724_s7 + $0x10] sm:$0xff] }
   0xe   :  { %v502_v47 = vld [vmem:[%s724_s7 + $0x50] sm:$0xff]  ;;  %v510_v48 = vld [vmem:[%s721_s4] ss:$0 sm:$0xff]  ;;  %v493_v55 = vld [vmem:[%s724_s7 + $0x8] sm:$0xff] }
   0xf   :  { %320 = vmatpush.bf16.msra.mxu0 %v498_v38  ;;  %v501_v56 = vld [vmem:[%s724_s7 + $0x48] sm:$0xff]  ;;  %v492_v57 = vld [vmem:[%s724_s7] sm:$0xff] }
  0x10   :  { %161 = vmatpush.bf16.msrb.mxu2 %v396_v27  ;;  %333 = vmatpush.bf16.msra.mxu1 %v506_v39  ;;  %v500_v58 = vld [vmem:[%s724_s7 + $0x40] sm:$0xff] }
  0x11   :  { %174 = vmatpush.bf16.msrb.mxu3 %v400_v29  ;;  %v105_v59 = vld [vmem:[%s723_s6] sm:$0x3]  ;;  %s542_s6 = smov [#allocation2]  }
  0x12   :  { %v107_v60 = vperm.slane %v105_v59, 0  ;;  %v108_v61 = vperm.slane %v105_v59, 1  ;;  %v511_v10 = vld [vmem:[%s725_s8] ss:$0 sm:$0xff]  ;;  %s368_s8 = sshll.u32 %s542_s6, 4  ;;  %s369_s8 = int_to_ptr.vmem [resolvable:$true] %s368_s8 }
  0x13   :  { %321 = vmatpush.bf16.msra.mxu0 %v497_v40 }
  0x14   :  { %162 = vmatpush.bf16.msrb.mxu2 %v388_v33  ;;  %334 = vmatpush.bf16.msra.mxu1 %v505_v41 }
  0x15   :  { %175 = vmatpush.bf16.msrb.mxu3 %v392_v35 }
  0x17   :  { %322 = vmatpush.bf16.msra.mxu0 %v496_v42 }
  0x18   :  { %335 = vmatpush.bf16.msra.mxu1 %v504_v43 }
  0x1b   :  { %323 = vmatpush.bf16.msra.mxu0 %v495_v44 }
  0x1c   :  { %336 = vmatpush.bf16.msra.mxu1 %v503_v45 }
  0x1f   :  { %324 = vmatpush.bf16.msra.mxu0 %v494_v46 }
  0x20   :  { %337 = vmatpush.bf16.msra.mxu1 %v502_v47 }
  0x23   :  { %325 = vmatpush.bf16.msra.mxu0 %v493_v55 }
  0x24   :  { %338 = vmatpush.bf16.msra.mxu1 %v501_v56 }
  0x27   :  { %326 = vmatpush.bf16.msra.mxu0 %v492_v57 }
  0x28   :  { %339 = vmatpush.bf16.msra.mxu1 %v500_v58 }
  0x89   :  { %v58_v18 = vpop.f32.mrf.mxu2 }
  0x8a   :  { %v59_v19 = vadd.f32 %v509_v17, %v58_v18 }
  0x8c   :  { %v62_v20 = vmul.f32 0.2, %v59_v19 }
  0x8e   :  { %v63_v21 = vmax.f32 %v59_v19, %v62_v20 }
  0x90   :  { %v64_v22 = vpack.c.bf16 %v63_v21, %v63_v21 }
  0x91   :  { %v60_v23 = vpop.f32.mrf.mxu2 }
  0x92   :  { %384 = vmatmul.msk.bf16.vlgmr.msra.gmra.mxu3 %vm77_vm2, %v64_v22 }
 0x115   :  { %v90_v49 = vpop.f32.mrf.mxu3 }
 0x116   :  { %v91_v50 = vadd.f32 %v510_v48, %v90_v49 }
 0x118   :  { %v94_v51 = vmul.f32 0.2, %v91_v50 }
 0x11a   :  { %v95_v52 = vmax.f32 %v91_v50, %v94_v51 }
 0x11c   :  { %v96_v53 = vpack.c.bf16 %v95_v52, %v95_v52 }
 0x11d   :  { %v92_v54 = vpop.f32.mrf.mxu3 }
 0x11e   :  { %417 = vmatmul.msk.bf16.vlgmr.msrb.gmra.mxu2 %vm151_vm3, %v96_v53  ;;  %418 = vmatmul.msk.bf16.vlgmr.msrb.gmra.mxu3 %vm151_vm3, %v96_v53 }
 0x1a1   :  { %v164_v62 = vpop.f32.mrf.mxu2  ;;  %v177_v63 = vpop.f32.mrf.mxu3 }
 0x1a2   :  { %v165_v0 = vadd.f32 %v164_v62, %v107_v60  ;;  %v178_v1 = vadd.f32 %v177_v63, %v108_v61 }
 0x1a4   :  { %v181_v2 = vmul.f32 0.2, %v165_v0  ;;  %v182_v3 = vmul.f32 0.2, %v178_v1 }
 0x1a6   :  { %v183_v4 = vmax.f32 %v165_v0, %v181_v2  ;;  %v184_v5 = vmax.f32 %v178_v1, %v182_v3 }
 0x1a8   :  { %v185_v6 = vpack.c.bf16 %v183_v4, %v183_v4  ;;  %v186_v7 = vpack.c.bf16 %v184_v5, %v184_v5 }
 0x1a9   :  { %v166_v8 = vpop.f32.mrf.mxu2  ;;  %v179_v9 = vpop.f32.mrf.mxu3 }
 0x1aa   :  { %327 = vmatmul.bf16.vlgmr.msra.gmra.mxu0 %v185_v6  ;;  %340 = vmatmul.bf16.vlgmr.msra.gmra.mxu1 %v186_v7 }
 0x227   :  { %v328_v11 = vpop.f32.mrf.mxu0  ;;  %v341_v12 = vpop.f32.mrf.mxu1 }
 0x228   :  { %v329_v13 = vadd.f32 %v511_v10, %v328_v11 }
 0x22a   :  { %v342_v14 = vadd.f32 %v341_v12, %v329_v13 }
 0x22c   :  { %v345_v15 = vmul.f32 0.2, %v342_v14 }
 0x22e   :  { %v346_v16 = vmax.f32 %v342_v14, %v345_v15 }
 0x22f   :  { %v330_v17 = vpop.f32.mrf.mxu0  ;;  %v343_v18 = vpop.f32.mrf.mxu1 }
 0x230   :  { %v347_v19 = vsel %vm41_vm1, %v346_v16, -inf }
 0x231   :  { %348 = vmax.xlane.f32.xlu0 %v347_v19 }
 0x2a4   :  { %v349_v20 = vpop.xlane.xlu0 %348 }
 0x2a5   :  { %v350_v21 = vsub.f32 %v346_v16, %v349_v20 }
 0x2a7   :  { %v351_v22 = vmul.f32 1.442695, %v350_v21 }
 0x2a9   :  { %512 = vpow2.f32 %v351_v22 }
 0x2af   :  { %v513_v23 = vpop.eup %512 }
 0x2b0   :  { %v353_v24 = vsel %vm41_vm1, %v513_v23, 0.0  ;;  %v360_v29 = vmul.f32 30.2, %v513_v23 }
 0x2b1   :  { %354 = vadd.xlane.f32.xlu0 %v353_v24 }
 0x324   :  { %v355_v25 = vpop.xlane.xlu0 %354 }
 0x325   :  { %514 = vrcp.f32 %v355_v25 }
 0x32b   :  { %v515_v26 = vpop.eup %514 }
 0x32c   :  { %v357_v27 = vmul.f32 %v515_v26, %v355_v25 }
 0x32e   :  { %v358_v28 = vsub.f32 2.0, %v357_v27 }
 0x330   :  { %v359_v30 = vmul.f32 %v515_v26, %v358_v28 }
 0x332   :  { %v361_v31 = vmul.f32 %v360_v29, %v359_v30 }
 0x334   :  { %362 = vst.msk [vmem:[#allocation2] sm:$0xff] %vm41_vm1, %v361_v31 }
 0x335   :  { %373 = dma.vmem_to_hbm [thread:$0]  %s369_s8, 128, %s371_s11, [#allocation3]  }
 0x336   :  { %540 = dma.done.wait [#allocation3], 128  }
 0x337   :  { %541 = vsyncadd [#allocation3], 4294967168 }
 0x338   :  { %378 = vsyncpa [#allocation3], 1 }

</bundles_post_ra>
